<compile_context>
chip_gen: v7x
topology: tpu7x:2x2x1
jax: 0.10.0
libtpu: 0.0.40
codegen_flags: <defaults>
</compile_context>

<pallas_src>
import functools

import jax
import jax.numpy as jnp
from jax import lax
from jax.experimental import pallas as pl
from jax.experimental.pallas import tpu as pltpu


# ------------------------------ tiling helpers ------------------------------

def _pick_tile(dim, preferred, align):
    """Largest multiple of `align` <= preferred that divides dim, else dim."""
    if dim <= preferred:
        return dim
    t = (preferred // align) * align
    while t >= align:
        if dim % t == 0:
            return t
        t -= align
    return dim


# ----------------------- Level 0: fused hidden + score ----------------------

def _level0_kernel(x_ref, wh_ref, bh_ref, c0_ref, b0_ref, o_ref):
    # x: [B, 2D], wh: [D, 2D], bh: [1, D], c0: [tn, D], b0: [1, tn] -> o: [B, tn]
    # hidden = x @ Wh^T + bh   (Cn_hidden Linear; Dropout is identity in eval)
    hidden = lax.dot_general(
        x_ref[...], wh_ref[...],
        dimension_numbers=(((1,), (1,)), ((), ())),
        preferred_element_type=jnp.float32) + bh_ref[...]
    # logits = hidden @ C0_tile^T + b0_tile ; probs = sigmoid(logits)
    logits = lax.dot_general(
        hidden, c0_ref[...],
        dimension_numbers=(((1,), (1,)), ((), ())),
        preferred_element_type=jnp.float32) + b0_ref[...]
    o_ref[...] = jax.nn.sigmoid(logits)


def level0_scores(feat0, Wh, bh, C0, b0):
    """sigmoid((Cn_hidden(feat0)) @ C0^T + b0), tiled over C0 rows."""
    B, Din = feat0.shape
    D = Wh.shape[0]
    N0 = C0.shape[0]
    tn = _pick_tile(N0, 512, 128)
    grid = (N0 // tn,)
    return pl.pallas_call(
        _level0_kernel,
        out_shape=jax.ShapeDtypeStruct((B, N0), jnp.float32),
        grid=grid,
        in_specs=[
            pl.BlockSpec((B, Din), lambda j: (0, 0)),
            pl.BlockSpec((D, Din), lambda j: (0, 0)),
            pl.BlockSpec((1, D), lambda j: (0, 0)),
            pl.BlockSpec((tn, D), lambda j: (j, 0)),
            pl.BlockSpec((1, tn), lambda j: (0, j)),
        ],
        out_specs=pl.BlockSpec((B, tn), lambda j: (0, j)),
        compiler_params=pltpu.CompilerParams(
            dimension_semantics=("parallel",)),
    )(feat0, Wh, bh.reshape(1, D), C0, b0.reshape(1, N0))


# --------------- Levels 1/2: fused gather + MXU candidate score --------------

def _cand_score_kernel(cand_ref, feat_ref, bias_ref, gsc_ref, cn_ref,
                       probs_ref, wprobs_ref, emb_buf, sem,
                       *, tc, last_level):
    # cand_ref: [B, C] int32 in SMEM (scalar prefetch)
    # feat:  [1, 1, D]   bias/gsc/out: [1, 1, tc]
    # cn_ref: [N, D] classifier table left in HBM (memory_space=pl.ANY)
    # emb_buf: VMEM scratch [tc, D]
    b = pl.program_id(0)
    ct = pl.program_id(1)
    c0 = ct * tc

    # Gather the tc candidate embedding rows HBM -> VMEM (async row DMAs).
    @pl.loop(0, tc)
    def _(c):
        idx = cand_ref[b, c0 + c]
        pltpu.make_async_copy(cn_ref.at[pl.ds(idx, 1), :],
                              emb_buf.at[pl.ds(c, 1), :], sem).start()

    @pl.loop(0, tc)
    def _(c):
        # Source index is irrelevant for the wait; only the transfer size is.
        pltpu.make_async_copy(cn_ref.at[pl.ds(0, 1), :],
                              emb_buf.at[pl.ds(c, 1), :], sem).wait()

    # MXU contraction over D: [1, D] x [tc, D] -> [1, tc]
    feat = feat_ref[0]                       # [1, D]
    emb = emb_buf[...]                       # [tc, D]
    logits = lax.dot_general(
        feat, emb, dimension_numbers=(((1,), (1,)), ((), ())),
        preferred_element_type=jnp.float32) + bias_ref[0]
    if last_level:
        # torch.where(logits == 0.0, -inf, logits).sigmoid()
        # TODO(synk): PyTorch upcasts to float64 before sigmoid on the last
        # level; computed in float32 here (sigmoid(-inf)=0 either way).
        logits = jnp.where(logits == 0.0, -jnp.inf, logits)
    probs = jax.nn.sigmoid(logits)           # [1, tc]
    probs_ref[0] = probs
    wprobs_ref[0] = probs * gsc_ref[0]


def cand_score(candidates, feat, bias_g, gsc, cn_table, *, last_level=False):
    """probs, weighted_probs for candidate indices scored against cn_table."""
    B, C = candidates.shape
    D = feat.shape[-1]
    tc = _pick_tile(C, 512, 128)
    nct = C // tc
    feat3 = feat.reshape(B, 1, D)
    bias3 = bias_g.reshape(B, 1, C)
    gsc3 = gsc.reshape(B, 1, C)

    kernel = functools.partial(_cand_score_kernel, tc=tc, last_level=last_level)
    probs, wprobs = pl.pallas_call(
        kernel,
        out_shape=(jax.ShapeDtypeStruct((B, 1, C), jnp.float32),
                   jax.ShapeDtypeStruct((B, 1, C), jnp.float32)),
        grid_spec=pltpu.PrefetchScalarGridSpec(
            num_scalar_prefetch=1,
            grid=(B, nct),
            in_specs=[
                pl.BlockSpec((1, 1, D), lambda b, ct, cand: (b, 0, 0)),
                pl.BlockSpec((1, 1, tc), lambda b, ct, cand: (b, 0, ct)),
                pl.BlockSpec((1, 1, tc), lambda b, ct, cand: (b, 0, ct)),
                pl.BlockSpec(memory_space=pl.ANY),   # classifier table in HBM
            ],
            out_specs=[
                pl.BlockSpec((1, 1, tc), lambda b, ct, cand: (b, 0, ct)),
                pl.BlockSpec((1, 1, tc), lambda b, ct, cand: (b, 0, ct)),
            ],
            scratch_shapes=[
                pltpu.VMEM((tc, D), cn_table.dtype),
                pltpu.SemaphoreType.DMA(()),
            ],
        ),
        compiler_params=pltpu.CompilerParams(
            dimension_semantics=("parallel", "parallel")),
    )(candidates, feat3, bias3, gsc3, cn_table)
    return probs.reshape(B, C), wprobs.reshape(B, C)


# ----------------------------- Forward (glue) -------------------------------

def feat_maker(recipe, bert_outs):
    feats = []
    for idx_list in recipe:
        if isinstance(idx_list, int):
            feats.append(bert_outs[idx_list][:, 0])
        elif isinstance(idx_list, tuple):
            feats.append(jnp.concatenate([bert_outs[idx][:, 0] for idx in idx_list], axis=1))
        else:
            raise ValueError('Invalid feat recipe')
    return feats


def cascade_xml_forward(bert_outs, params, clusters, topk):
    """Inference path of CascadeXML.forward (is_training=False, return_out=False)."""
    layers = [(0, 1), 2, 3]
    feats = feat_maker(layers, bert_outs)
    B = feats[0].shape[0]

    Cn = params['Cn']            # [ [N0,D], [N1,D], [N2,D] ]
    Cn_bias = params['Cn_bias']  # [ [N0], [N1], [N2] ]
    num_ele = params['num_ele']

    all_probs, all_probs_weighted, all_candidates = [], [], []
    prev_probs, prev_cands = None, None

    for i in range(3):
        feat = feats[i]
        # embed_drops[i] (and the Dropout inside Cn_hidden) are identity in eval.
        if i == 0:
            N0 = Cn[0].shape[0]
            candidates = jnp.broadcast_to(
                jnp.arange(N0, dtype=jnp.int32)[None, :], (B, N0))
            # Level 0: Cn_hidden + full-table scoring fused in one kernel.
            probs = level0_scores(feat, params['Wh'], params['bh'],
                                  Cn[0], Cn_bias[0])
            wprobs = probs  # weighted_scores == candidates_scores at level 0
        else:
            # get_candidates(prev_logits, prev_cands, level=i)  [glue JAX]
            k = topk[i - 1]
            scores, idx = lax.top_k(prev_probs, k)                     # [B, k]
            indices = jnp.take_along_axis(prev_cands, idx, axis=1)     # [B, k]
            cand_groups = clusters[i - 1][indices]                     # [B, k, mc]
            mc = cand_groups.shape[-1]
            candidates = cand_groups.reshape(B, k * mc).astype(jnp.int32)
            group_scores = jnp.broadcast_to(
                scores[..., None], (B, k, mc)).reshape(B, k * mc).astype(jnp.float32)

            if i == 2:
                # PyTorch drops entries equal to num_ele[2] (the pad index) and
                # re-pads with pad_sequence.  The synthetic clusters here are
                # uniform (no pad entries), so that filtering is a no-op.
                assert num_ele[2] == Cn[2].shape[0]

            bias_g = Cn_bias[i][candidates]   # [B, C] scalar gather (glue)
            probs, wprobs = cand_score(candidates, feat, bias_g, group_scores,
                                       Cn[i], last_level=(i == 2))

        all_probs.append(probs)
        all_probs_weighted.append(wprobs)
        all_candidates.append(candidates)
        prev_probs = probs        # prev_logits = candidates_scores.detach()
        prev_cands = candidates

    return all_probs, all_candidates, all_probs_weighted


# --------------------------- Deterministic setup ----------------------------

def xavier_uniform(key, shape):
    fan_out, fan_in = shape
    limit = (6.0 / (fan_in + fan_out)) ** 0.5
    return jax.random.uniform(key, shape, jnp.float32, -limit, limit)


if __name__ == "__main__":
    B, S, D = 2, 8, 32          # batch, seq, emb_dim
    N0, mc0, mc1 = 16, 4, 4     # level-0 clusters, children per cluster
    N1 = N0 * mc0               # 64 level-1 clusters
    N2 = N1 * mc1               # 256 leaf labels (= taxonomy.n_nodes - 1)
    topk = [8, 8]               # candidates_topk (scaled down for small shapes)

    key = jax.random.PRNGKey(0)
    keys = jax.random.split(key, 10)

    # Synthetic backbone outputs (the 4 transformer layers used by layers=[(0,1),2,3]).
    bert_outs = [jax.random.normal(keys[i], (B, S, D), jnp.float32) for i in range(4)]

    # Uniform, disjoint cluster hierarchy (no padding entries needed).
    clusters = [
        jnp.arange(N1, dtype=jnp.int32).reshape(N0, mc0),
        jnp.arange(N2, dtype=jnp.int32).reshape(N1, mc1),
    ]

    C0 = xavier_uniform(keys[4], (N0, D))
    C1 = xavier_uniform(keys[5], (N1, D))
    C2 = xavier_uniform(keys[6], (N2, D))
    C2 = C2.at[-1].set(0.0)  # self.Cn[-1].weight[-1].data.fill_(0)
    Wh = xavier_uniform(keys[7], (D, 2 * D))  # Cn_hidden Linear(2*emb_dim, emb_dim)
    bh = jax.random.uniform(keys[8], (D,), jnp.float32, -1.0, 1.0) / (2 * D) ** 0.5

    params = dict(
        Cn=[C0, C1, C2],
        Cn_bias=[jnp.zeros((N0,), jnp.float32),   # Cn_bias weights filled with 0
                 jnp.zeros((N1,), jnp.float32),
                 jnp.zeros((N2,), jnp.float32)],
        Wh=Wh, bh=bh,
        num_ele=[N0, N1, N2],
    )

    all_probs, all_candidates, all_probs_weighted = cascade_xml_forward(
        bert_outs, params, clusters, topk)
    jax.tree_util.tree_map(jax.block_until_ready,
                           (all_probs, all_candidates, all_probs_weighted))
    print("KERNEL_OK")
</pallas_src>

<mosaic_0001>
module attributes {stable_mosaic.version = 11 : i64} {
  func.func @_level0_kernel(%arg0: i32, %arg1: memref<2x64xf32, #tpu.memory_space<vmem>>, %arg2: memref<32x64xf32, #tpu.memory_space<vmem>>, %arg3: memref<1x32xf32, #tpu.memory_space<vmem>>, %arg4: memref<16x32xf32, #tpu.memory_space<vmem>>, %arg5: memref<1x16xf32, #tpu.memory_space<vmem>>, %arg6: memref<2x16xf32, #tpu.memory_space<vmem>>) attributes {dimension_semantics = [#tpu.dimension_semantics<parallel>], iteration_bounds = array<i64: 1>, scalar_prefetch = 0 : i64, scratch_operands = 0 : i64, tpu.core_type = #tpu.core_type<tc>, window_params = [{pipeline_mode = #tpu.pipeline_mode<synchronous>, transform_indices = @transform_0, window_bounds = array<i64: 2, 64>}, {pipeline_mode = #tpu.pipeline_mode<synchronous>, transform_indices = @transform_1, window_bounds = array<i64: 32, 64>}, {pipeline_mode = #tpu.pipeline_mode<synchronous>, transform_indices = @transform_2, window_bounds = array<i64: 1, 32>}, {transform_indices = @transform_3, window_bounds = array<i64: 16, 32>}, {transform_indices = @transform_4, window_bounds = array<i64: 1, 16>}, {transform_indices = @transform_5, window_bounds = array<i64: 2, 16>}]} {
    %c0 = arith.constant 0 : index
    %c0_0 = arith.constant 0 : index
    %0 = vector.load %arg1[%c0, %c0_0] : memref<2x64xf32, #tpu.memory_space<vmem>>, vector<2x64xf32>
    %c0_1 = arith.constant 0 : index
    %c0_2 = arith.constant 0 : index
    %1 = vector.load %arg2[%c0_1, %c0_2] : memref<32x64xf32, #tpu.memory_space<vmem>>, vector<32x64xf32>
    %cst = arith.constant dense<0.000000e+00> : vector<2x32xf32>
    %2 = tpu.matmul %0, %1, %cst {dimension_numbers = #tpu.dot_dimension_numbers<[1], [1], [0], [0], [0, 0, 1, 0], [], []>} : vector<2x64xf32>, vector<32x64xf32>, vector<2x32xf32> -> vector<2x32xf32>
    %c0_3 = arith.constant 0 : index
    %c0_4 = arith.constant 0 : index
    %3 = vector.load %arg3[%c0_3, %c0_4] : memref<1x32xf32, #tpu.memory_space<vmem>>, vector<1x32xf32>
    %4 = vector.broadcast %3 : vector<1x32xf32> to vector<2x32xf32>
    %5 = arith.addf %2, %4 : vector<2x32xf32>
    %c0_5 = arith.constant 0 : index
    %c0_6 = arith.constant 0 : index
    %6 = vector.load %arg4[%c0_5, %c0_6] : memref<16x32xf32, #tpu.memory_space<vmem>>, vector<16x32xf32>
    %cst_7 = arith.constant dense<0.000000e+00> : vector<2x16xf32>
    %7 = tpu.matmul %5, %6, %cst_7 {dimension_numbers = #tpu.dot_dimension_numbers<[1], [1], [0], [0], [0, 0, 1, 0], [], []>} : vector<2x32xf32>, vector<16x32xf32>, vector<2x16xf32> -> vector<2x16xf32>
    %c0_8 = arith.constant 0 : index
    %c0_9 = arith.constant 0 : index
    %8 = vector.load %arg5[%c0_8, %c0_9] : memref<1x16xf32, #tpu.memory_space<vmem>>, vector<1x16xf32>
    %9 = vector.broadcast %8 : vector<1x16xf32> to vector<2x16xf32>
    %10 = arith.addf %7, %9 : vector<2x16xf32>
    %11 = arith.negf %10 : vector<2x16xf32>
    %12 = math.exp %11 : vector<2x16xf32>
    %cst_10 = arith.constant 1.000000e+00 : f32
    %13 = vector.broadcast %cst_10 : f32 to vector<2x16xf32>
    %14 = arith.addf %13, %12 : vector<2x16xf32>
    %15 = arith.divf %13, %14 : vector<2x16xf32>
    %c0_11 = arith.constant 0 : index
    %c0_12 = arith.constant 0 : index
    %16 = vector.load %arg6[%c0_11, %c0_12] : memref<2x16xf32, #tpu.memory_space<vmem>>, vector<2x16xf32>
    tpu.vector_store %arg6[%c0_11, %c0_12], %15 {strides = array<i32>} : memref<2x16xf32, #tpu.memory_space<vmem>>, vector<2x16xf32>,
    return
  }
  func.func @transform_0(%arg0: i32) -> (i32, i32) {
    %c0_i32 = arith.constant 0 : i32
    %c0_i32_0 = arith.constant 0 : i32
    %c0_i32_1 = arith.constant 0 : i32
    return %c0_i32, %c0_i32_0 : i32, i32
  }
  func.func @transform_1(%arg0: i32) -> (i32, i32) {
    %c0_i32 = arith.constant 0 : i32
    %c0_i32_0 = arith.constant 0 : i32
    %c0_i32_1 = arith.constant 0 : i32
    return %c0_i32, %c0_i32_0 : i32, i32
  }
  func.func @transform_2(%arg0: i32) -> (i32, i32) {
    %c0_i32 = arith.constant 0 : i32
    %c0_i32_0 = arith.constant 0 : i32
    %c0_i32_1 = arith.constant 0 : i32
    return %c0_i32, %c0_i32_0 : i32, i32
  }
  func.func @transform_3(%arg0: i32) -> (i32, i32) {
    %c0_i32 = arith.constant 0 : i32
    %c0_i32_0 = arith.constant 0 : i32
    return %arg0, %c0_i32 : i32, i32
  }
  func.func @transform_4(%arg0: i32) -> (i32, i32) {
    %c0_i32 = arith.constant 0 : i32
    %c0_i32_0 = arith.constant 0 : i32
    return %c0_i32, %arg0 : i32, i32
  }
  func.func @transform_5(%arg0: i32) -> (i32, i32) {
    %c0_i32 = arith.constant 0 : i32
    %c0_i32_0 = arith.constant 0 : i32
    return %c0_i32, %arg0 : i32, i32
  }
}

</mosaic_0001>

<bundles_post_ra>
// kernel: tpu_custom_call.1
= control target key start
LH: loop header
LB: loop body
LE: loop exit
PB: predicated region body
PF: predicated region fallthrough
CT: control target
= control target key end

     0   :  { %10 = vsyncpa [#allocation3], 0  ;;  %s532_s0 = inlined_call_operand.hbm [shape: f32[2,64], index: 0, kind: input, shape index: {}]   ;;  %s533_s1 = inlined_call_operand.hbm [shape: f32[32,64], index: 1, kind: input, shape index: {}]   ;;  %s534_s2 = inlined_call_operand.vmem [shape: f32[1,32], index: 2, kind: input, shape index: {}]   ;;  %s535_s3 = inlined_call_operand.hbm [shape: f32[16,32], index: 3, kind: input, shape index: {}]   ;;  %s536_s4 = inlined_call_operand.vmem [shape: f32[1,16], index: 4, kind: input, shape index: {}]   ;;  %s537_s5 = inlined_call_operand.hbm [shape: f32[2,16], index: 5, kind: output, shape index: {}]  }
   0x1   :  { %11 = vsyncpa [#allocation6], 0 }
   0x2   :  { %12 = vsyncpa [#allocation4], 0  ;;  %s427_s18 = smov [#allocation5]   ;;  %s333_s22 = scalar_lea.hbm %s533_s1, 512 }
   0x3   :  { %s28_s19 = sshll.u32 %s427_s18, 4  ;;  %p334_p0 = scmp.ne.s32.totalorder %s533_s1, %s333_s22  ;;  %s29_s19 = int_to_ptr.vmem [resolvable:$true] %s28_s19 }
   0x4   :  { %p337_p1 = scmp.lt.u32.totalorder %s333_s22, %s533_s1 }
   0x6   :  { %p339_p2 = pnand %p337_p1, %p334_p0 }
   0x8   :  { %342 = shalt.err (!%p339_p2)
}
   0x9   :  { %s343_s27 = scalar_lea.vmem %s29_s19, 512  ;;  %p348_p4 = scmp.lt.s32.totalorder %s29_s19, %s29_s19 }
   0xa   :  { %p344_p3 = scmp.ne.s32.totalorder %s29_s19, %s343_s27  ;;  %p349_p5 = scmp.lt.s32.totalorder %s343_s27, %s343_s27 }
   0xc   :  { %p350_p6 = por %p349_p5, %p348_p4 }
   0xe   :  { %p351_p7 = pnand %p350_p6, %p344_p3 }
  0x10   :  { %354 = shalt.err (!%p351_p7)
}
  0x11   :  { %s428_s28 = smov 128   ;;  %s429_s29 = smov 8  }
  0x12   :  { %34 = dma.hbm_to_vmem [thread:$0]  %s533_s1, 512, %s29_s19, [#allocation6], %s428_s28, %s428_s28, %s429_s29  }
  0x13   :  { %s430_s7 = smov [#allocation2]   ;;  %s431_s9 = smov [#allocation7]  }
  0x14   :  { %s19_s8 = sshll.u32 %s430_s7, 4  ;;  %s42_s10 = sshll.u32 %s431_s9, 4  ;;  %s20_s8 = int_to_ptr.vmem [resolvable:$true] %s19_s8  ;;  %s43_s10 = int_to_ptr.vmem [resolvable:$true] %s42_s10 }
  0x15   :  { %s355_s13 = scalar_lea.hbm %s532_s0, 32 }
  0x16   :  { %p356_p8 = scmp.ne.s32.totalorder %s532_s0, %s355_s13  ;;  %p359_p9 = scmp.lt.u32.totalorder %s355_s13, %s532_s0 }
  0x18   :  { %p361_p10 = pnand %p359_p9, %p356_p8 }
  0x1a   :  { %364 = shalt.err (!%p361_p10)
}
  0x1b   :  { %s365_s1 = scalar_lea.vmem %s20_s8, 32  ;;  %p370_p12 = scmp.lt.s32.totalorder %s20_s8, %s20_s8 }
  0x1c   :  { %p366_p11 = scmp.ne.s32.totalorder %s20_s8, %s365_s1  ;;  %p371_p13 = scmp.lt.s32.totalorder %s365_s1, %s365_s1 }
  0x1e   :  { %p372_p0 = por %p371_p13, %p370_p12 }
  0x20   :  { %p373_p1 = pnand %p372_p0, %p366_p11 }
  0x22   :  { %376 = shalt.err (!%p373_p1)
}
  0x23   :  { %22 = dma.hbm_to_vmem [thread:$0]  %s532_s0, 32, %s20_s8, [#allocation3]  }
  0x24   :  { %s377_s22 = scalar_lea.hbm %s535_s3, 256 }
  0x25   :  { %p378_p2 = scmp.ne.s32.totalorder %s535_s3, %s377_s22  ;;  %p381_p3 = scmp.lt.u32.totalorder %s377_s22, %s535_s3 }
  0x27   :  { %p383_p4 = pnand %p381_p3, %p378_p2 }
  0x29   :  { %386 = shalt.err (!%p383_p4)
}
  0x2a   :  { %s387_s27 = scalar_lea.vmem %s43_s10, 256  ;;  %p392_p6 = scmp.lt.s32.totalorder %s43_s10, %s43_s10 }
  0x2b   :  { %p388_p5 = scmp.ne.s32.totalorder %s43_s10, %s387_s27  ;;  %p393_p7 = scmp.lt.s32.totalorder %s387_s27, %s387_s27 }
  0x2d   :  { %p394_p8 = por %p393_p7, %p392_p6 }
  0x2f   :  { %p395_p9 = pnand %p394_p8, %p388_p5 }
  0x31   :  { %398 = shalt.err (!%p395_p9)
}
  0x32   :  { %48 = dma.hbm_to_vmem [thread:$0]  %s535_s3, 256, %s43_s10, [#allocation6], %s428_s28, %s428_s28, %s429_s29  }
  0x33   :  { %421 = dma.done.wait [#allocation3], 32  }
  0x34   :  { %422 = vsyncadd [#allocation3], 4294967264 }
  0x35   :  { %423 = dma.done.wait [#allocation6], 768  }
  0x36   :  { %424 = vsyncadd [#allocation6], 4294966528  ;;  %v432_v0 = vmov 0.0|0.0   ;;  %vm433_vm0 = vmmov 0   ;;  %v434_v1 = vmov 0.0   ;;  %vm72_vm1 = vcmask 523264  }
  0x37   :  { %308 = vmatprep.subr.bf16.mxu0 %v432_v0  ;;  %298 = vmatprep.mubr.msk.f32.mxu0 %vm433_vm0, %v434_v1  ;;  %vm167_vm2 = vcmask 261120   ;;  %v61_v2 = vld [vmem:[#allocation5] sm:$0xff]  ;;  %v62_v3 = vld [vmem:[#allocation5 + $0x8] sm:$0xff]  ;;  %vm310_vm3 = vmpackc.low %vm72_vm1, %vm72_vm1  ;;  %s435_s7 = smov [#allocation8]   ;;  %vm253_vm5 = vcmask 123904  }
  0x38   :  { %316 = vmatprep.subr.bf16.mxu1 %v432_v0  ;;  %305 = vmatprep.mubr.msk.f32.mxu1 %vm433_vm0, %v434_v1  ;;  %v309_v4 = vpack.c.bf16 %v62_v3, %v61_v2  ;;  %v158_v5 = vld [vmem:[#allocation7] sm:$0xff]  ;;  %v159_v6 = vld [vmem:[#allocation7 + $0x8] sm:$0xff]  ;;  %vm318_vm4 = vmpackc.low %vm167_vm2, %vm167_vm2  ;;  %s261_s8 = sshll.u32 %s435_s7, 4  ;;  %s262_s8 = int_to_ptr.vmem [resolvable:$true] %s261_s8 }
  0x39   :  { %v317_v7 = vpack.c.bf16 %v159_v6, %v158_v5  ;;  %v63_v8 = vld [vmem:[#allocation5 + $0x10] sm:$0xff]  ;;  %v64_v9 = vld [vmem:[#allocation5 + $0x18] sm:$0xff]  ;;  %p404_p11 = scmp.lt.s32.totalorder %s262_s8, %s262_s8 }
  0x3a   :  { %311 = vmatpush3.bf16.xpose.msk.msra.mxu0 %vm310_vm3, %v309_v4  ;;  %v313_v10 = vpack.c.bf16 %v64_v9, %v63_v8  ;;  %v60_v11 = vld [vmem:[#allocation2] sm:$0x3] }
  0x3b   :  { %312 = vmatprep.subr.bf16.mxu0 %v432_v0  ;;  %319 = vmatpush3.bf16.xpose.msk.msra.mxu1 %vm318_vm4, %v317_v7  ;;  %v271_v12 = vld [vmem:[%s534_s2] ss:$0 sm:$0xff]  ;;  %s399_s2 = scalar_lea.vmem %s262_s8, 32 }
  0x3c   :  { %v277_v16 = vld [vmem:[%s536_s4] ss:$0 sm:$0xff]  ;;  %p400_p10 = scmp.ne.s32.totalorder %s262_s8, %s399_s2  ;;  %p405_p12 = scmp.lt.s32.totalorder %s399_s2, %s399_s2 }
  0x3e   :  { %p406_p13 = por %p405_p12, %p404_p11 }
  0x40   :  { %p407_p0 = pnand %p406_p13, %p400_p10 }
  0x42   :  { %315 = vmatpush3.bf16.xpose.msk.msra.mxu0 %vm310_vm3, %v313_v10 }
  0x49   :  { %299 = vmatmul.mubr.msk.f32.vlgmr.msra.gmra.mrb[0].mxu0 %vm72_vm1, %v60_v11 }
 0x11c   :  { %v154_v13 = vpop.f32.mrb[0].mxu0 }
 0x11d   :  { %v155_v14 = vadd.f32 %v271_v12, %v154_v13  ;;  %v300_v15 = vpop.f32.mrb[1].mxu0 }
 0x11f   :  { %306 = vmatmul.mubr.msk.f32.vlgmr.msra.gmra.mrb[0].mxu1 %vm167_vm2, %v155_v14 }
 0x1f2   :  { %v243_v17 = vpop.f32.mrb[0].mxu1 }
 0x1f3   :  { %v244_v18 = vadd.f32 %v277_v16, %v243_v17  ;;  %v307_v19 = vpop.f32.mrb[1].mxu1 }
 0x1f5   :  { %v281_v20 = vmul.f32 -1.442695, %v244_v18 }
 0x1f7   :  { %329 = vpow2.f32 %v281_v20 }
 0x201   :  { %v330_v21 = vpop.eup %329 }
 0x202   :  { %v250_v22 = vadd.f32 1.0, %v330_v21 }
 0x204   :  { %331 = vrcp.f32 %v250_v22 }
 0x20e   :  { %v332_v23 = vpop.eup %331 }
 0x20f   :  { %254 = vst.msk [vmem:[#allocation8] sm:$0x3] %vm253_vm5, %v332_v23 }
 0x210   :  { %410 = shalt.err (!%p407_p0)
}
 0x211   :  { %s411_s10 = scalar_lea.hbm %s537_s5, 32 }
 0x212   :  { %p412_p1 = scmp.ne.s32.totalorder %s537_s5, %s411_s10  ;;  %p415_p2 = scmp.lt.u32.totalorder %s411_s10, %s537_s5 }
 0x214   :  { %p417_p3 = pnand %p415_p2, %p412_p1 }
 0x216   :  { %420 = shalt.err (!%p417_p3)
}
 0x217   :  { %264 = dma.vmem_to_hbm [thread:$0]  %s262_s8, 32, %s537_s5, [#allocation4]  }
 0x218   :  { %425 = dma.done.wait [#allocation4], 32  }
 0x219   :  { %426 = vsyncadd [#allocation4], 4294967264 }
 0x21a   :  { %268 = vsyncpa [#allocation3], 1 }
 0x21b   :  { %269 = vsyncpa [#allocation6], 1 }
 0x21c   :  { %270 = vsyncpa [#allocation4], 1 }

</bundles_post_ra>
